<compile_context>
chip_gen: v7x
topology: tpu7x:2x2x1
jax: 0.10.0
libtpu: 0.0.40
codegen_flags: <defaults>
</compile_context>

<pallas_src>
import functools

import jax
import jax.numpy as jnp
from jax import lax
from jax.experimental import pallas as pl
from jax.experimental.pallas import tpu as pltpu

# "-inf" stand-in; exp(_BIG_NEG - finite) underflows to exactly 0.
_BIG_NEG = -1e30


def _stats_kernel(x_ref, p_ref, m_ref, s_ref, *, n, lane_width, block_rows,
                  num_blocks, num_outputs, tail_mask):
    """Per-block partial softmax (dim-0) stats.

    x_ref : (block_rows, lane_width) VMEM   flattened-batch slab
    p_ref : (num_outputs, 2)         SMEM   [:, 0] = w_eff, [:, 1] = b_eff
    m_ref : (1, 1, num_outputs)      VMEM   partial max of z = w*x + b
    s_ref : (1, 1, num_outputs)      VMEM   partial sum of exp(z - m)
    """
    blk = pl.program_id(0)

    def emit(masked):
        x = x_ref[...]                                     # (block_rows, lane_width)
        if masked:
            rows = lax.broadcasted_iota(jnp.int32, x.shape, 0)
            cols = lax.broadcasted_iota(jnp.int32, x.shape, 1)
            gidx = (rows + blk * block_rows) * lane_width + cols
            valid = gidx < n
        ms, ss = [], []
        for o in range(num_outputs):                       # static, tiny (2)
            w = p_ref[o, 0]                                # SMEM scalars
            b = p_ref[o, 1]
            z = x * w + b                                  # dense VPU FMA
            if masked:
                z = jnp.where(valid, z, _BIG_NEG)
            m_o = jnp.max(jnp.max(z, axis=1, keepdims=True), axis=0, keepdims=True)
            e = jnp.exp(z - m_o)                           # EUP
            s_o = jnp.sum(jnp.sum(e, axis=1, keepdims=True), axis=0, keepdims=True)
            ms.append(m_o)
            ss.append(s_o)
        m_ref[...] = jnp.concatenate(ms, axis=1).reshape(1, 1, num_outputs)
        s_ref[...] = jnp.concatenate(ss, axis=1).reshape(1, 1, num_outputs)

    if tail_mask and num_blocks > 1:
        # Only the final block can contain flat padding / out-of-range rows.
        @pl.when(blk < num_blocks - 1)
        def _full():
            emit(False)

        @pl.when(blk == num_blocks - 1)
        def _tail():
            emit(True)
    else:
        emit(tail_mask)


def _normalize_kernel(x_ref, q_ref, o_ref, *, num_outputs):
    """out[o] = exp(w_eff[o] * x + (b_eff[o] - m[o] - log s[o])) as dense slabs.

    x_ref : (block_rows, lane_width)               VMEM
    q_ref : (num_outputs, 2)                       SMEM  [:,0]=w_eff, [:,1]=b-m-log(s)
    o_ref : (num_outputs, block_rows, lane_width)  VMEM  lane-dense stores
    """
    x = x_ref[...]
    for o in range(num_outputs):                           # static, tiny (2)
        w = q_ref[o, 0]
        c = q_ref[o, 1]
        o_ref[o] = jnp.exp(x * w + c)


def discrete_model_forward(x, w1, b1, w2, b2, *, lane_width=512, block_rows=1024,
                           batch_major_output=True):
    """x: (N, 1); w1: (1, H); b1: (1, H); w2: (H, num_outputs); b2: (1, num_outputs).

    Returns softmax(linear2(linear1(x)), dim=0) with shape (N, num_outputs) by
    default.  batch_major_output=False returns the kernel-native
    (num_outputs, N) layout and skips the wrapper transpose.
    """
    assert lane_width % 128 == 0 and block_rows % 8 == 0
    n = x.shape[0]
    assert n >= 1
    num_outputs = w2.shape[1]
    f32 = jnp.float32
    hi = jax.lax.Precision.HIGHEST

    # --- Algebraic fusion of the two linear layers (no nonlinearity between). ---
    w_eff = jnp.dot(w1.astype(f32), w2.astype(f32), precision=hi).reshape(num_outputs)
    b_eff = (jnp.dot(b1.astype(f32), w2.astype(f32), precision=hi)
             + b2.astype(f32)).reshape(num_outputs)

    # --- Sublane/lane-dense (R, lane_width) batch layout. ---
    xf = x.astype(f32).reshape(n)
    r = -(-n // lane_width)
    pad = r * lane_width - n
    if pad:                              # only pad when N % lane_width != 0
        xf = jnp.pad(xf, (0, pad))
    x2d = xf.reshape(r, lane_width)      # reshape is free when pad == 0

    if r <= block_rows:
        block_r, num_blocks = r, 1       # degenerates to one fetch + one writeback
    else:
        block_r = block_rows
        num_blocks = -(-r // block_r)
    tail_mask = (pad > 0) or (r % block_r != 0)

    compiler_params = pltpu.CompilerParams(
        dimension_semantics=("parallel",),        # v7x: shard blocks over both TCs
        vmem_limit_bytes=48 * 1024 * 1024,        # stays within v7x's 64 MiB VMEM
    )
    smem_spec = pl.BlockSpec(memory_space=pltpu.MemorySpace.SMEM)
    x_spec = pl.BlockSpec((block_r, lane_width), lambda i: (i, 0))

    # ---- Pass 1: per-block partial max / sum(exp) stats (parallel blocks). ----
    params = jnp.stack([w_eff, b_eff], axis=1)    # (num_outputs, 2)
    stats_kernel = functools.partial(
        _stats_kernel, n=n, lane_width=lane_width, block_rows=block_r,
        num_blocks=num_blocks, num_outputs=num_outputs, tail_mask=tail_mask)
    part_m, part_s = pl.pallas_call(
        stats_kernel,
        out_shape=(jax.ShapeDtypeStruct((num_blocks, 1, num_outputs), f32),
                   jax.ShapeDtypeStruct((num_blocks, 1, num_outputs), f32)),
        grid_spec=pltpu.PrefetchScalarGridSpec(
            num_scalar_prefetch=0,
            grid=(num_blocks,),
            in_specs=[x_spec, smem_spec],
            out_specs=[pl.BlockSpec((1, 1, num_outputs), lambda i: (i, 0, 0)),
                       pl.BlockSpec((1, 1, num_outputs), lambda i: (i, 0, 0))],
        ),
        compiler_params=compiler_params,
    )(x2d, params)

    # Tiny XLA combine of the per-block partials; fold -m - log(s) into the
    # exponent so the normalize pass is a single FMA + exp (no reciprocal).
    pm = part_m[:, 0, :]                          # (num_blocks, num_outputs)
    ps = part_s[:, 0, :]
    m = jnp.max(pm, axis=0)                       # (num_outputs,)
    s = jnp.sum(ps * jnp.exp(pm - m[None, :]), axis=0)
    coef = jnp.stack([w_eff, b_eff - m - jnp.log(s)], axis=1)   # (num_outputs, 2)

    # ---- Pass 2: normalize + write lane-dense (num_outputs, R, C) slabs. ----
    out2d = pl.pallas_call(
        functools.partial(_normalize_kernel, num_outputs=num_outputs),
        out_shape=jax.ShapeDtypeStruct((num_outputs, r, lane_width), f32),
        grid_spec=pltpu.PrefetchScalarGridSpec(
            num_scalar_prefetch=0,
            grid=(num_blocks,),
            in_specs=[x_spec, smem_spec],
            out_specs=pl.BlockSpec((num_outputs, block_r, lane_width),
                                   lambda i: (0, i, 0)),
        ),
        compiler_params=compiler_params,
    )(x2d, coef)

    out_lane_major = out2d.reshape(num_outputs, r * lane_width)[:, :n]
    if batch_major_output:
        # Module convention (N, num_outputs); costs one XLA slice+transpose pass.
        return out_lane_major.T
    return out_lane_major


def reference_forward(x, w1, b1, w2, b2):
    hi = jax.lax.Precision.HIGHEST
    h = jnp.dot(x, w1, precision=hi) + b1
    z = jnp.dot(h, w2, precision=hi) + b2
    z = z - jnp.max(z, axis=0, keepdims=True)
    e = jnp.exp(z)
    return e / jnp.sum(e, axis=0, keepdims=True)


def _check(out, ref):
    assert out.shape == ref.shape, (out.shape, ref.shape)
    assert out.dtype == jnp.float32
    assert bool(jnp.all(jnp.isfinite(out)))
    assert jnp.allclose(out, ref, atol=1e-4, rtol=1e-3), (out, ref)
    col = jnp.sum(out, axis=0)
    assert jnp.allclose(col, jnp.ones_like(col), atol=1e-4), col


if __name__ == "__main__":
    num_outputs = 2
    hidden = 10

    key = jax.random.PRNGKey(0)
    kx, k1, kb1, k2, kb2 = jax.random.split(key, 5)

    # Parameters with nn.Linear(1, 10) / nn.Linear(10, 2) shapes (pre-transposed).
    w1 = jax.random.normal(k1, (1, hidden), jnp.float32) * 0.5              # Linear1 weight^T
    b1 = jax.random.normal(kb1, (1, hidden), jnp.float32) * 0.1             # Linear1 bias
    w2 = jax.random.normal(k2, (hidden, num_outputs), jnp.float32) * 0.5    # Linear2 weight^T
    b2 = jax.random.normal(kb2, (1, num_outputs), jnp.float32) * 0.1        # Linear2 bias

    # Case 1: tiny batch (module's typical usage) — single block, masked tail.
    n = 8
    x = jax.random.normal(kx, (n, 1), jnp.float32)
    ref = reference_forward(x, w1, b1, w2, b2)
    out = jax.block_until_ready(discrete_model_forward(x, w1, b1, w2, b2))
    _check(out, ref)
    out_lm = jax.block_until_ready(
        discrete_model_forward(x, w1, b1, w2, b2, batch_major_output=False))
    _check(out_lm.T, ref)

    # Case 2: multi-block with partial tail block + flat padding — exercises the
    # parallel partial-stats reduction and the pl.when-gated masked tail path.
    n2 = 2500
    x2 = jax.random.normal(kx, (n2, 1), jnp.float32)
    out2 = jax.block_until_ready(
        discrete_model_forward(x2, w1, b1, w2, b2, lane_width=128, block_rows=8))
    _check(out2, reference_forward(x2, w1, b1, w2, b2))

    # Case 3: exact fit — no padding, mask-free path.
    n3 = 1024
    x3 = jax.random.normal(kx, (n3, 1), jnp.float32)
    out3 = jax.block_until_ready(
        discrete_model_forward(x3, w1, b1, w2, b2, lane_width=128, block_rows=8))
    _check(out3, reference_forward(x3, w1, b1, w2, b2))

    print("KERNEL_OK")
</pallas_src>

<mosaic_0001>
module attributes {stable_mosaic.version = 11 : i64} {
  func.func @_stats_kernel(%arg0: i32, %arg1: memref<1x512xf32, #tpu.memory_space<vmem>>, %arg2: memref<2x2xf32, #tpu.memory_space<smem>>, %arg3: memref<1x1x2xf32, #tpu.memory_space<vmem>>, %arg4: memref<1x1x2xf32, #tpu.memory_space<vmem>>) attributes {dimension_semantics = [#tpu.dimension_semantics<parallel>], iteration_bounds = array<i64: 1>, scalar_prefetch = 0 : i64, scratch_operands = 0 : i64, tpu.core_type = #tpu.core_type<tc>, window_params = [{transform_indices = @transform_0, window_bounds = array<i64: 1, 512>}, {transform_indices = @transform_1, window_bounds = array<i64: 2, 2>}, {transform_indices = @transform_2, window_bounds = array<i64: 1, 1, 2>}, {transform_indices = @transform_3, window_bounds = array<i64: 1, 1, 2>}]} {
    %c0 = arith.constant 0 : index
    %c0_0 = arith.constant 0 : index
    %0 = vector.load %arg1[%c0, %c0_0] : memref<1x512xf32, #tpu.memory_space<vmem>>, vector<1x512xf32>
    %1 = tpu.iota {dimensions = array<i32: 0>} : vector<1x512xi32>
    %2 = tpu.iota {dimensions = array<i32: 1>} : vector<1x512xi32>
    %c1_i32 = arith.constant 1 : i32
    %3 = arith.muli %arg0, %c1_i32 : i32
    %4 = vector.broadcast %3 : i32 to vector<1x512xi32>
    %5 = arith.addi %1, %4 : vector<1x512xi32>
    %c512_i32 = arith.constant 512 : i32
    %6 = vector.broadcast %c512_i32 : i32 to vector<1x512xi32>
    %7 = arith.muli %5, %6 : vector<1x512xi32>
    %8 = arith.addi %7, %2 : vector<1x512xi32>
    %c8_i32 = arith.constant 8 : i32
    %9 = vector.broadcast %c8_i32 : i32 to vector<1x512xi32>
    %10 = arith.cmpi slt, %8, %9 : vector<1x512xi32>
    %c0_1 = arith.constant 0 : index
    %c0_2 = arith.constant 0 : index
    %11 = memref.load %arg2[%c0_1, %c0_2] : memref<2x2xf32, #tpu.memory_space<smem>>
    %c0_3 = arith.constant 0 : index
    %c1 = arith.constant 1 : index
    %12 = memref.load %arg2[%c0_3, %c1] : memref<2x2xf32, #tpu.memory_space<smem>>
    %13 = vector.broadcast %11 : f32 to vector<1x512xf32>
    %14 = arith.mulf %0, %13 : vector<1x512xf32>
    %15 = vector.broadcast %12 : f32 to vector<1x512xf32>
    %16 = arith.addf %14, %15 : vector<1x512xf32>
    %cst = arith.constant -1.000000e+30 : f32
    %17 = vector.broadcast %cst : f32 to vector<1x512xf32>
    %18 = arith.select %10, %16, %17 : vector<1x512xi1>, vector<1x512xf32>
    %cst_4 = arith.constant dense<0xFF800000> : vector<1xf32>
    %19 = vector.multi_reduction <maximumf>, %18, %cst_4 [1] : vector<1x512xf32> to vector<1xf32>
    %20 = vector.shape_cast %19 : vector<1xf32> to vector<1x1xf32>
    %cst_5 = arith.constant dense<0xFF800000> : vector<1xf32>
    %21 = vector.multi_reduction <maximumf>, %20, %cst_5 [0] : vector<1x1xf32> to vector<1xf32>
    %22 = vector.shape_cast %21 : vector<1xf32> to vector<1x1xf32>
    %23 = vector.broadcast %22 : vector<1x1xf32> to vector<1x512xf32>
    %24 = arith.subf %18, %23 : vector<1x512xf32>
    %25 = math.exp %24 : vector<1x512xf32>
    %cst_6 = arith.constant dense<0.000000e+00> : vector<1xf32>
    %26 = vector.multi_reduction <add>, %25, %cst_6 [1] : vector<1x512xf32> to vector<1xf32>
    %27 = vector.shape_cast %26 : vector<1xf32> to vector<1x1xf32>
    %cst_7 = arith.constant dense<0.000000e+00> : vector<1xf32>
    %28 = vector.multi_reduction <add>, %27, %cst_7 [0] : vector<1x1xf32> to vector<1xf32>
    %29 = vector.shape_cast %28 : vector<1xf32> to vector<1x1xf32>
    %c1_8 = arith.constant 1 : index
    %c0_9 = arith.constant 0 : index
    %30 = memref.load %arg2[%c1_8, %c0_9] : memref<2x2xf32, #tpu.memory_space<smem>>
    %c1_10 = arith.constant 1 : index
    %c1_11 = arith.constant 1 : index
    %31 = memref.load %arg2[%c1_10, %c1_11] : memref<2x2xf32, #tpu.memory_space<smem>>
    %32 = vector.broadcast %30 : f32 to vector<1x512xf32>
    %33 = arith.mulf %0, %32 : vector<1x512xf32>
    %34 = vector.broadcast %31 : f32 to vector<1x512xf32>
    %35 = arith.addf %33, %34 : vector<1x512xf32>
    %cst_12 = arith.constant -1.000000e+30 : f32
    %36 = vector.broadcast %cst_12 : f32 to vector<1x512xf32>
    %37 = arith.select %10, %35, %36 : vector<1x512xi1>, vector<1x512xf32>
    %cst_13 = arith.constant dense<0xFF800000> : vector<1xf32>
    %38 = vector.multi_reduction <maximumf>, %37, %cst_13 [1] : vector<1x512xf32> to vector<1xf32>
    %39 = vector.shape_cast %38 : vector<1xf32> to vector<1x1xf32>
    %cst_14 = arith.constant dense<0xFF800000> : vector<1xf32>
    %40 = vector.multi_reduction <maximumf>, %39, %cst_14 [0] : vector<1x1xf32> to vector<1xf32>
    %41 = vector.shape_cast %40 : vector<1xf32> to vector<1x1xf32>
    %42 = vector.broadcast %41 : vector<1x1xf32> to vector<1x512xf32>
    %43 = arith.subf %37, %42 : vector<1x512xf32>
    %44 = math.exp %43 : vector<1x512xf32>
    %cst_15 = arith.constant dense<0.000000e+00> : vector<1xf32>
    %45 = vector.multi_reduction <add>, %44, %cst_15 [1] : vector<1x512xf32> to vector<1xf32>
    %46 = vector.shape_cast %45 : vector<1xf32> to vector<1x1xf32>
    %cst_16 = arith.constant dense<0.000000e+00> : vector<1xf32>
    %47 = vector.multi_reduction <add>, %46, %cst_16 [0] : vector<1x1xf32> to vector<1xf32>
    %48 = vector.shape_cast %47 : vector<1xf32> to vector<1x1xf32>
    %49 = tpu.concatenate %22, %41 in 1 : vector<1x1xf32>, vector<1x1xf32> -> vector<1x2xf32>
    %50 = vector.shape_cast %49 : vector<1x2xf32> to vector<1x1x2xf32>
    %c0_17 = arith.constant 0 : index
    %c0_18 = arith.constant 0 : index
    %c0_19 = arith.constant 0 : index
    %51 = vector.load %arg3[%c0_17, %c0_18, %c0_19] : memref<1x1x2xf32, #tpu.memory_space<vmem>>, vector<1x1x2xf32>
    tpu.vector_store %arg3[%c0_17, %c0_18, %c0_19], %50 {strides = array<i32>} : memref<1x1x2xf32, #tpu.memory_space<vmem>>, vector<1x1x2xf32>,
    %52 = tpu.concatenate %29, %48 in 1 : vector<1x1xf32>, vector<1x1xf32> -> vector<1x2xf32>
    %53 = vector.shape_cast %52 : vector<1x2xf32> to vector<1x1x2xf32>
    %c0_20 = arith.constant 0 : index
    %c0_21 = arith.constant 0 : index
    %c0_22 = arith.constant 0 : index
    %54 = vector.load %arg4[%c0_20, %c0_21, %c0_22] : memref<1x1x2xf32, #tpu.memory_space<vmem>>, vector<1x1x2xf32>
    tpu.vector_store %arg4[%c0_20, %c0_21, %c0_22], %53 {strides = array<i32>} : memref<1x1x2xf32, #tpu.memory_space<vmem>>, vector<1x1x2xf32>,
    return
  }
  func.func @transform_0(%arg0: i32) -> (i32, i32) {
    %c0_i32 = arith.constant 0 : i32
    %c0_i32_0 = arith.constant 0 : i32
    return %arg0, %c0_i32 : i32, i32
  }
  func.func @transform_1(%arg0: i32) -> (i32, i32) {
    %c0_i32 = arith.constant 0 : i32
    %c0_i32_0 = arith.constant 0 : i32
    %c0_i32_1 = arith.constant 0 : i32
    return %c0_i32, %c0_i32_0 : i32, i32
  }
  func.func @transform_2(%arg0: i32) -> (i32, i32, i32) {
    %c0_i32 = arith.constant 0 : i32
    %c0_i32_0 = arith.constant 0 : i32
    %c0_i32_1 = arith.constant 0 : i32
    return %arg0, %c0_i32, %c0_i32_0 : i32, i32, i32
  }
  func.func @transform_3(%arg0: i32) -> (i32, i32, i32) {
    %c0_i32 = arith.constant 0 : i32
    %c0_i32_0 = arith.constant 0 : i32
    %c0_i32_1 = arith.constant 0 : i32
    return %arg0, %c0_i32, %c0_i32_0 : i32, i32, i32
  }
}

</mosaic_0001>

<bundles_post_ra>
// kernel: tpu_custom_call.1
= control target key start
LH: loop header
LB: loop body
LE: loop exit
PB: predicated region body
PF: predicated region fallthrough
CT: control target
= control target key end

     0   :  { %9 = vsyncpa [#allocation3], 0  ;;  %s420_s0 = inlined_call_operand.hbm [shape: f32[1,512], index: 0, kind: input, shape index: {}]   ;;  %s421_s1 = inlined_call_operand.vmem [shape: f32[2,2], index: 1, kind: input, shape index: {}]   ;;  %s422_s2 = inlined_call_operand.hbm [shape: f32[1,1,2], index: 2, kind: output, shape index: {0}]   ;;  %s423_s3 = inlined_call_operand.hbm [shape: f32[1,1,2], index: 3, kind: output, shape index: {1}]  }
   0x1   :  { %10 = vsyncpa [#allocation5], 0 }
   0x2   :  { %11 = vsyncpa [#allocation4], 0 }
   0x3   :  { %12 = vsyncpa [#allocation9], 0  ;;  %s29_s14 = sshll.u32 %s421_s1, 4  ;;  %s329_s15 = smov [#allocation2]   ;;  %s30_s14 = int_to_ptr.vmem [resolvable:$true] %s29_s14 }
   0x4   :  { %s19_s16 = sshll.u32 %s329_s15, 4  ;;  %s243_s19 = scalar_lea.hbm %s420_s0, 64  ;;  %s20_s16 = int_to_ptr.vmem [resolvable:$true] %s19_s16 }
   0x5   :  { %p244_p0 = scmp.ne.s32.totalorder %s420_s0, %s243_s19  ;;  %p247_p1 = scmp.lt.u32.totalorder %s243_s19, %s420_s0 }
   0x7   :  { %p249_p2 = pnand %p247_p1, %p244_p0 }
   0x9   :  { %252 = shalt.err (!%p249_p2)
}
   0xa   :  { %s253_s24 = scalar_lea.vmem %s20_s16, 64  ;;  %p258_p4 = scmp.lt.s32.totalorder %s20_s16, %s20_s16 }
   0xb   :  { %p254_p3 = scmp.ne.s32.totalorder %s20_s16, %s253_s24  ;;  %p259_p5 = scmp.lt.s32.totalorder %s253_s24, %s253_s24 }
   0xd   :  { %p260_p6 = por %p259_p5, %p258_p4 }
   0xf   :  { %p261_p7 = pnand %p260_p6, %p254_p3 }
  0x11   :  { %264 = shalt.err (!%p261_p7)
}
  0x12   :  { %22 = dma.hbm_to_vmem [thread:$0]  %s420_s0, 64, %s20_s16, [#allocation3]  }
  0x13   :  { %s265_s26 = scalar_lea.vmem %s30_s14, 32  ;;  %p270_p9 = scmp.lt.s32.totalorder %s30_s14, %s30_s14 }
  0x14   :  { %p266_p8 = scmp.ne.s32.totalorder %s30_s14, %s265_s26  ;;  %p271_p10 = scmp.lt.s32.totalorder %s265_s26, %s265_s26 }
  0x16   :  { %p272_p11 = por %p271_p10, %p270_p9 }
  0x18   :  { %p273_p12 = pnand %p272_p11, %p266_p8 }
  0x1a   :  { %276 = shalt.err (!%p273_p12)
}
  0x1b   :  { %s330_s27 = smov [#allocation6]  }
  0x1c   :  { %32 = dma.vmem_to_smem %s30_s14, 32, %s330_s27, [#allocation5]  }
  0x1d   :  { %321 = dma.done.wait [#allocation3], 64  }
  0x1e   :  { %322 = vsyncadd [#allocation3], 4294967232 }
  0x1f   :  { %323 = dma.done.wait [#allocation5], 32  }
  0x20   :  { %324 = vsyncadd [#allocation5], 4294967264 }
  0x21   :  { %39 = sfence }
  0x22   :  { %v41_v0 = vlaneseq  ;;  %s59_s28 = sld [smem:[#allocation6]]  ;;  %s220_s29 = sld [smem:[#allocation6 + $0x1]]  ;;  %v40_v7 = vld [vmem:[#allocation2] sm:$0xf]  ;;  %vm90_vm0 = vcmask 1040384   ;;  %vm184_vm5 = vcmask 7168  }
  0x23   :  { %s221_s30 = sld [smem:[#allocation6 + $0x80]]  ;;  %s222_s4 = sld [smem:[#allocation6 + $0x81]]  ;;  %vm186_vm6 = vcmask 8192  }
  0x24   :  { %v42_v1 = vshrl.u32 %v41_v0, 7  ;;  %v44_v2 = vand.u32 127, %v41_v0  ;;  %s331_s0 = smov [#allocation7]  }
  0x25   :  { %s196_s5 = sshll.u32 %s331_s0, 4  ;;  %s197_s5 = int_to_ptr.vmem [resolvable:$true] %s196_s5 }
  0x26   :  { %v45_v3 = vadd.s32 128, %v44_v2  ;;  %v46_v4 = vadd.s32 256, %v44_v2  ;;  %v47_v5 = vadd.s32 384, %v44_v2  ;;  %v50_v6 = vmul.u32 512, %v42_v1  ;;  %s277_s6 = scalar_lea.vmem %s197_s5, 16  ;;  %s281_s7 = scalar_lea.vmem %s197_s5, 32 }
  0x27   :  { %v68_v8 = vsub.s32 0, %v42_v1  ;;  %v72_v9 = vsub.s32 1, %v42_v1  ;;  %v76_v19 = vsub.s32 2, %v42_v1  ;;  %v80_v20 = vsub.s32 3, %v42_v1  ;;  %p278_p13 = scmp.ne.s32.totalorder %s197_s5, %s277_s6  ;;  %p282_p0 = scmp.lt.s32.totalorder %s197_s5, %s197_s5 }
  0x28   :  { %v51_v10 = vadd.s32 %v50_v6, %v44_v2  ;;  %v52_v11 = vadd.s32 %v50_v6, %v45_v3  ;;  %v61_v12 = vstv %s59_s28  ;;  %v53_v14 = vadd.s32 %v50_v6, %v46_v4  ;;  %p283_p1 = scmp.lt.s32.totalorder %s281_s7, %s277_s6 }
  0x29   :  { %v124_v13 = vstv %s221_s30  ;;  %v54_v15 = vadd.s32 %v50_v6, %v47_v5  ;;  %v63_v16 = vstv %s220_s29  ;;  %v126_v17 = vstv %s222_s4 }
  0x2a   :  { %v62_v18 = vmul.f32 %v61_v12, %v40_v7  ;;  %v125_v21 = vmul.f32 %v124_v13, %v40_v7  ;;  %vm55_vm1 = vcmp.lt.s32.totalorder %v51_v10, 8  ;;  %vm56_vm2 = vcmp.lt.s32.totalorder %v52_v11, 8  ;;  %p284_p2 = por %p283_p1, %p282_p0 }
  0x2b   :  { %vm57_vm3 = vcmp.lt.s32.totalorder %v53_v14, 8  ;;  %vm58_vm4 = vcmp.lt.s32.totalorder %v54_v15, 8 }
  0x2c   :  { %v64_v22 = vadd.f32 %v63_v16, %v62_v18  ;;  %v127_v23 = vadd.f32 %v126_v17, %v125_v21  ;;  %p285_p3 = pnand %p284_p2, %p278_p13 }
  0x2e   :  { %v69_v24 = vrot.slane %v64_v22, %v68_v8  ;;  %v73_v25 = vrot.slane %v64_v22, %v72_v9  ;;  %v77_v26 = vrot.slane %v64_v22, %v76_v19  ;;  %v81_v27 = vrot.slane %v64_v22, %v80_v20 }
  0x2f   :  { %v132_v28 = vrot.slane %v127_v23, %v68_v8  ;;  %v136_v29 = vrot.slane %v127_v23, %v72_v9  ;;  %v140_v30 = vrot.slane %v127_v23, %v76_v19  ;;  %v144_v31 = vrot.slane %v127_v23, %v80_v20 }
  0x30   :  { %v86_v32 = vsel %vm55_vm1, %v69_v24, -1e+30  ;;  %v87_v33 = vsel %vm56_vm2, %v73_v25, -1e+30  ;;  %v88_v34 = vsel %vm57_vm3, %v77_v26, -1e+30 }
  0x31   :  { %v89_v35 = vsel %vm58_vm4, %v81_v27, -1e+30  ;;  %v91_v36 = vsel %vm90_vm0, %v86_v32, -inf  ;;  %v92_v37 = vsel %vm90_vm0, %v87_v33, -inf  ;;  %v93_v38 = vsel %vm90_vm0, %v88_v34, -inf }
  0x32   :  { %v94_v39 = vsel %vm90_vm0, %v89_v35, -inf  ;;  %v95_v40 = vmax.f32 %v91_v36, %v92_v37  ;;  %v149_v41 = vsel %vm55_vm1, %v132_v28, -1e+30  ;;  %v150_v42 = vsel %vm56_vm2, %v136_v29, -1e+30 }
  0x33   :  { %v96_v43 = vmax.f32 %v93_v38, %v94_v39  ;;  %v151_v44 = vsel %vm57_vm3, %v140_v30, -1e+30  ;;  %v152_v45 = vsel %vm58_vm4, %v144_v31, -1e+30  ;;  %v153_v46 = vsel %vm90_vm0, %v149_v41, -inf }
  0x34   :  { %v154_v47 = vsel %vm90_vm0, %v150_v42, -inf  ;;  %v155_v48 = vsel %vm90_vm0, %v151_v44, -inf  ;;  %v156_v49 = vsel %vm90_vm0, %v152_v45, -inf }
  0x35   :  { %v97_v50 = vmax.f32 %v95_v40, %v96_v43  ;;  %v157_v51 = vmax.f32 %v153_v46, %v154_v47  ;;  %v158_v52 = vmax.f32 %v155_v48, %v156_v49 }
  0x37   :  { %98 = vmax.xlane.f32.xlu0 %v97_v50  ;;  %v159_v53 = vmax.f32 %v157_v51, %v158_v52 }
  0x3b   :  { %160 = vmax.xlane.f32.xlu0 %v159_v53 }
  0xc4   :  { %v99_v54 = vpop.xlane.xlu0 %98 }
  0xc5   :  { %v100_v55 = vsub.f32 %v86_v32, %v99_v54  ;;  %v101_v56 = vsub.f32 %v87_v33, %v99_v54  ;;  %v102_v57 = vsub.f32 %v88_v34, %v99_v54  ;;  %v103_v58 = vsub.f32 %v89_v35, %v99_v54 }
  0xc7   :  { %v104_v59 = vmul.f32 1.442695, %v100_v55  ;;  %v106_v60 = vmul.f32 1.442695, %v101_v56  ;;  %v108_v61 = vmul.f32 1.442695, %v102_v57 }
  0xc8   :  { %v110_v62 = vmul.f32 1.442695, %v103_v58  ;;  %v161_v63 = vpop.xlane.xlu0 %160 }
  0xc9   :  { %227 = vpow2.f32 %v104_v59  ;;  %v162_v0 = vsub.f32 %v149_v41, %v161_v63  ;;  %v163_v1 = vsub.f32 %v150_v42, %v161_v63  ;;  %v164_v2 = vsub.f32 %v151_v44, %v161_v63 }
  0xca   :  { %229 = vpow2.f32 %v106_v60  ;;  %v165_v3 = vsub.f32 %v152_v45, %v161_v63  ;;  %v185_v4 = vsel %vm184_vm5, %v99_v54, %v161_v63 }
  0xcb   :  { %231 = vpow2.f32 %v108_v61  ;;  %v166_v5 = vmul.f32 1.442695, %v162_v0  ;;  %v168_v6 = vmul.f32 1.442695, %v163_v1  ;;  %v170_v7 = vmul.f32 1.442695, %v164_v2 }
  0xcc   :  { %187 = vst.msk [vmem:[#allocation7] sm:$0x1] %vm186_vm6, %v185_v4  ;;  %233 = vpow2.f32 %v110_v62  ;;  %v172_v8 = vmul.f32 1.442695, %v165_v3 }
  0xcd   :  { %235 = vpow2.f32 %v166_v5 }
  0xce   :  { %237 = vpow2.f32 %v168_v6 }
  0xcf   :  { %239 = vpow2.f32 %v170_v7 }
  0xd0   :  { %241 = vpow2.f32 %v172_v8 }
  0xd3   :  { %v228_v9 = vpop.eup %227 }
  0xd4   :  { %v230_v10 = vpop.eup %229  ;;  %v112_v11 = vsel %vm90_vm0, %v228_v9, 0.0 }
  0xd5   :  { %v232_v12 = vpop.eup %231  ;;  %v113_v13 = vsel %vm90_vm0, %v230_v10, 0.0 }
  0xd6   :  { %v234_v14 = vpop.eup %233  ;;  %v114_v15 = vadd.f32 %v113_v13, %v112_v11  ;;  %v115_v17 = vsel %vm90_vm0, %v232_v12, 0.0 }
  0xd7   :  { %v236_v16 = vpop.eup %235  ;;  %v117_v22 = vsel %vm90_vm0, %v234_v14, 0.0 }
  0xd8   :  { %v238_v18 = vpop.eup %237  ;;  %v116_v19 = vadd.f32 %v115_v17, %v114_v15  ;;  %v174_v20 = vsel %vm90_vm0, %v236_v16, 0.0 }
  0xd9   :  { %v240_v21 = vpop.eup %239  ;;  %v175_v23 = vsel %vm90_vm0, %v238_v18, 0.0 }
  0xda   :  { %v242_v24 = vpop.eup %241  ;;  %v118_v25 = vadd.f32 %v117_v22, %v116_v19  ;;  %v176_v26 = vadd.f32 %v175_v23, %v174_v20  ;;  %v177_v27 = vsel %vm90_vm0, %v240_v21, 0.0 }
  0xdb   :  { %v179_v29 = vsel %vm90_vm0, %v242_v24, 0.0 }
  0xdc   :  { %119 = vadd.xlane.f32.xlu1 %v118_v25  ;;  %v178_v28 = vadd.f32 %v177_v27, %v176_v26 }
  0xde   :  { %v180_v30 = vadd.f32 %v179_v29, %v178_v28 }
  0xe0   :  { %181 = vadd.xlane.f32.xlu1 %v180_v30 }
  0xe1   :  { %288 = shalt.err (!%p285_p3)
}
  0xe2   :  { %s289_s10 = scalar_lea.hbm %s422_s2, 16 }
  0xe3   :  { %p290_p4 = scmp.ne.s32.totalorder %s422_s2, %s289_s10  ;;  %p293_p5 = scmp.lt.u32.totalorder %s289_s10, %s422_s2 }
  0xe5   :  { %p295_p6 = pnand %p293_p5, %p290_p4 }
  0xe7   :  { %298 = shalt.err (!%p295_p6)
}
  0xe8   :  { %199 = dma.vmem_to_hbm [thread:$0]  %s197_s5, 16, %s422_s2, [#allocation4]  }
  0xe9   :  { %s332_s17 = smov [#allocation8]  }
  0xea   :  { %s206_s18 = sshll.u32 %s332_s17, 4  ;;  %s207_s18 = int_to_ptr.vmem [resolvable:$true] %s206_s18 }
  0xeb   :  { %s299_s19 = scalar_lea.vmem %s207_s18, 16  ;;  %s303_s20 = scalar_lea.vmem %s207_s18, 32 }
  0xec   :  { %p300_p7 = scmp.ne.s32.totalorder %s207_s18, %s299_s19  ;;  %p304_p8 = scmp.lt.s32.totalorder %s207_s18, %s207_s18 }
  0xed   :  { %p305_p9 = scmp.lt.s32.totalorder %s303_s20, %s299_s19 }
  0xef   :  { %p306_p10 = por %p305_p9, %p304_p8 }
  0xf1   :  { %p307_p11 = pnand %p306_p10, %p300_p7 }
 0x169   :  { %v120_v31 = vpop.xlane.xlu1 %119 }
 0x16d   :  { %v182_v32 = vpop.xlane.xlu1 %181 }
 0x16e   :  { %v188_v33 = vsel %vm184_vm5, %v120_v31, %v182_v32 }
 0x16f   :  { %189 = vst.msk [vmem:[#allocation8] sm:$0x1] %vm186_vm6, %v188_v33 }
 0x170   :  { %310 = shalt.err (!%p307_p11)
}
 0x171   :  { %s311_s2 = scalar_lea.hbm %s423_s3, 16 }
 0x172   :  { %p312_p12 = scmp.ne.s32.totalorder %s423_s3, %s311_s2  ;;  %p315_p13 = scmp.lt.u32.totalorder %s311_s2, %s423_s3 }
 0x174   :  { %p317_p0 = pnand %p315_p13, %p312_p12 }
 0x176   :  { %320 = shalt.err (!%p317_p0)
}
 0x177   :  { %209 = dma.vmem_to_hbm [thread:$0]  %s207_s18, 16, %s423_s3, [#allocation9]  }
 0x178   :  { %325 = dma.done.wait [#allocation4], 16  }
 0x179   :  { %326 = vsyncadd [#allocation4], 4294967280 }
 0x17a   :  { %327 = dma.done.wait [#allocation9], 16  }
 0x17b   :  { %328 = vsyncadd [#allocation9], 4294967280 }
 0x17c   :  { %216 = vsyncpa [#allocation3], 1 }
 0x17d   :  { %217 = vsyncpa [#allocation4], 1 }
 0x17e   :  { %218 = vsyncpa [#allocation9], 1 }
 0x17f   :  { %219 = vsyncpa [#allocation5], 1 }

</bundles_post_ra>
